<compile_context>
chip_gen: v7x
topology: tpu7x:2x2x1
jax: 0.10.0
libtpu: 0.0.40
codegen_flags: <defaults>
</compile_context>

<pallas_src>
import functools

import jax
import jax.numpy as jnp
from jax.experimental import pallas as pl
from jax.experimental.pallas import tpu as pltpu


def _cross_kernel_folded(x0_ref, xl_ref, w_ref, bias_ref, o_ref, *, precision):
    """out = x0 * (xl @ W) + bias + xl on one (tile, width) packed batch tile."""
    xl = xl_ref[...].astype(jnp.float32)
    x0 = x0_ref[...].astype(jnp.float32)
    proj = jnp.dot(xl, w_ref[...], preferred_element_type=jnp.float32,
                   precision=precision)                      # single MXU matmul
    o_ref[...] = (x0 * proj + bias_ref[...] + xl).astype(o_ref.dtype)


def _cross_kernel_lowrank(x0_ref, xl_ref, uwT_ref, vwT_ref, bias_ref, o_ref, *,
                          precision):
    """Un-folded path (only when D is large relative to rank and not packable)."""
    xl = xl_ref[...].astype(jnp.float32)
    x0 = x0_ref[...].astype(jnp.float32)
    h = jnp.dot(xl, uwT_ref[...], preferred_element_type=jnp.float32,
                precision=precision)                          # (T, R)
    proj = jnp.dot(h, vwT_ref[...], preferred_element_type=jnp.float32,
                   precision=precision)                       # (T, D)
    o_ref[...] = (x0 * proj + bias_ref[...] + xl).astype(o_ref.dtype)


def _cdiv(a, b):
    return -(-a // b)


def _round_up(x, m):
    return _cdiv(x, m) * m


def _tpu_budget_and_cores():
    """Returns (VMEM tile budget in bytes, #TensorCores sharing one Pallas grid)."""
    vmem_cap = None
    try:
        info = pltpu.get_tpu_info()
        vmem_cap = int(getattr(info, "vmem_capacity_bytes", 0)) or None
    except Exception:
        vmem_cap = None
    if vmem_cap is None:
        vmem_cap = 64 << 20              # conservative fallback: v7x per-TC VMEM
    kind = ""
    try:
        kind = jax.devices()[0].device_kind.lower()
    except Exception:
        pass
    # A single Pallas grid is sharded over 2 TensorCores on megacore (v4/v5p)
    # and dual-TC v7x chips; v5e/v6e execute the grid serially on one TC.
    multi_tc = any(t in kind for t in ("v4", "v5p", "v7"))
    budget = min(int(vmem_cap * 0.7), 96 << 20)   # ~44 MiB on v7x, ~90 MiB v5e/v6e
    return budget, (2 if multi_tc else 1)


def cross_layer_v2(x0, xl, u_w, v_w, bias, *, max_tile_rows=8192):
    """DCN-v2 cross layer: x0 * V(U(xl)) + bias + xl.

    x0, xl : (B, D) activations (f32 or bf16)
    u_w    : (R, D)  == torch U.weight
    v_w    : (D, R)  == torch V.weight
    bias   : (D,)
    """
    B, D = x0.shape
    R = u_w.shape[0]
    act_dtype = x0.dtype
    itemsize = jnp.dtype(act_dtype).itemsize
    # Exact f32 matmul when activations are f32 (mem-bound kernel: MXU slack is
    # large on all generations); bf16 activations use the normal MXU pass.
    precision = (jax.lax.Precision.HIGHEST
                 if jnp.dtype(act_dtype) == jnp.dtype(jnp.float32)
                 else jax.lax.Precision.DEFAULT)

    # --- layout / fusion decisions -------------------------------------------
    pack = (D <= 128) and (128 % D == 0)
    P = 128 // D if pack else 1
    width = P * D
    # Fold U@V when cheap (D <= 4R) or whenever we pack (block-diag weight is
    # at most 128x128). The folded weight / bias stay f32: they are resident
    # (fetched once), so the extra bytes cost nothing and avoid an extra
    # bf16 rounding of the U@V product.
    fold = pack or (D <= 4 * R)

    if fold:
        w_fold = u_w.T.astype(jnp.float32) @ v_w.T.astype(jnp.float32)   # (D, D)
        if P > 1:
            w_full = jnp.kron(jnp.eye(P, dtype=jnp.float32), w_fold)     # (width, width)
        else:
            w_full = w_fold
        weight_args = (w_full,)
        weight_shapes = ((width, width),)
        resident_bytes = width * width * 4 + width * 4
        kernel = functools.partial(_cross_kernel_folded, precision=precision)
    else:
        weight_args = (u_w.T.astype(jnp.float32), v_w.T.astype(jnp.float32))
        weight_shapes = ((D, R), (R, D))
        resident_bytes = 2 * D * R * 4 + width * 4
        kernel = functools.partial(_cross_kernel_lowrank, precision=precision)

    bias_p = jnp.tile(bias.astype(jnp.float32), P).reshape(1, width)

    # --- ragged batch: pad only to a multiple of P (<= P-1 rows) --------------
    padded_B = _round_up(B, P)
    pad = padded_B - B
    if pad:
        x0p = jnp.pad(x0, ((0, pad), (0, 0)))
        xlp = jnp.pad(xl, ((0, pad), (0, 0)))
    else:
        x0p, xlp = x0, xl
    rows = padded_B // P
    # Row-major reshape: free "packing" of P consecutive batch rows per lane row.
    x0p = x0p.reshape(rows, width)
    xlp = xlp.reshape(rows, width)

    # --- tiling ----------------------------------------------------------------
    budget, num_tc = _tpu_budget_and_cores()
    per_row = 3 * 2 * width * itemsize                 # x0/xl/out, double-buffered
    rows_by_vmem = max(16, (budget - 2 * resident_bytes) // per_row)
    max_tile = max(16, min(max_tile_rows, (rows_by_vmem // 16) * 16))

    if rows <= max_tile and not (num_tc > 1 and rows >= 32):
        # Single grid step: single-TC chips, or batch too small to split.
        tile, steps = rows, 1
    else:
        steps = _cdiv(rows, max_tile)
        if num_tc > 1:
            # >= 2 and even so both TensorCores run equal numbers of steps.
            steps = max(2, steps)
            steps += steps % 2
        # Balanced tiles: waste <= 15 rows instead of up to tile-1.
        tile = _round_up(_cdiv(rows, steps), 16)
        steps = _cdiv(rows, tile)                      # actual grid size
        # Partial last block: OOB rows read garbage but every row is
        # independent (no reduction) and Pallas drops the OOB output writes.

    act_spec = pl.BlockSpec((tile, width), lambda i: (i, 0))

    act_buf_bytes = 3 * 2 * tile * width * itemsize
    vmem_limit = int(max(16 << 20, act_buf_bytes + 2 * resident_bytes + (4 << 20)))

    flops = 2 * rows * width * (width if fold else 2 * R) + 3 * rows * width
    cost = pl.CostEstimate(
        flops=flops, transcendentals=0,
        bytes_accessed=3 * rows * width * itemsize + resident_bytes)

    def _resident_spec(shape, single_buffered):
        # Constant index_map => operand is resident across the whole grid;
        # Buffered(1) drops the redundant second pipeline buffer.
        if single_buffered:
            return pl.BlockSpec(shape, lambda i: (0,) * len(shape),
                                pipeline_mode=pl.Buffered(1))
        return pl.BlockSpec(shape, lambda i: (0,) * len(shape))

    def _run(single_buffered):
        in_specs = ([act_spec, act_spec]
                    + [_resident_spec(s, single_buffered) for s in weight_shapes]
                    + [_resident_spec((1, width), single_buffered)])
        return pl.pallas_call(
            kernel,
            out_shape=jax.ShapeDtypeStruct((rows, width), act_dtype),
            grid_spec=pltpu.PrefetchScalarGridSpec(
                num_scalar_prefetch=0,
                grid=(steps,),
                in_specs=in_specs,
                out_specs=act_spec,
            ),
            compiler_params=pltpu.CompilerParams(
                dimension_semantics=("parallel",),
                vmem_limit_bytes=vmem_limit),
            cost_estimate=cost,
        )(x0p, xlp, *weight_args, bias_p)

    try:
        out = _run(single_buffered=True)
    except Exception:
        # pipeline_mode / Buffered(1) not supported on this jax version: fall
        # back to default double-buffered resident operands (tiny cost here).
        out = _run(single_buffered=False)

    out = out.reshape(padded_B, D)
    return out[:B] if pad else out


def cross_layer_v2_ref(x0, xl, u_w, v_w, bias):
    # Pure-JAX reference matching the PyTorch forward exactly.
    h = xl @ u_w.T
    proj = h @ v_w.T
    return x0 * proj + bias + xl


if __name__ == "__main__":
    # Small shapes consistent with the module: batch=16, input_dim=32, rank=8.
    B, D, R = 16, 32, 8
    key = jax.random.PRNGKey(0)
    k1, k2, k3, k4, k5 = jax.random.split(key, 5)

    x0 = jax.random.normal(k1, (B, D), dtype=jnp.float32)
    xl = jax.random.normal(k2, (B, D), dtype=jnp.float32)

    # Deterministic parameter init (nn.Linear-style uniform scaling).
    u_w = jax.random.uniform(k3, (R, D), minval=-1.0, maxval=1.0,
                             dtype=jnp.float32) / jnp.sqrt(D)    # U.weight
    v_w = jax.random.uniform(k4, (D, R), minval=-1.0, maxval=1.0,
                             dtype=jnp.float32) / jnp.sqrt(R)    # V.weight
    bias = 0.1 * jax.random.normal(k5, (D,), dtype=jnp.float32)  # self.bias

    out = jax.block_until_ready(cross_layer_v2(x0, xl, u_w, v_w, bias))
    ref = cross_layer_v2_ref(x0, xl, u_w, v_w, bias)
    assert out.shape == (B, D)
    assert jnp.allclose(out, ref, atol=1e-5, rtol=1e-5)

    # Ragged batch: wrapper pads only to a multiple of P (<= 3 rows).
    out13 = jax.block_until_ready(cross_layer_v2(x0[:13], xl[:13], u_w, v_w, bias))
    assert out13.shape == (13, D)
    assert jnp.allclose(out13, ref[:13], atol=1e-5, rtol=1e-5)

    # bf16 activation I/O (halves HBM traffic); accumulation stays f32 in-kernel.
    x0b, xlb = x0.astype(jnp.bfloat16), xl.astype(jnp.bfloat16)
    outb = jax.block_until_ready(cross_layer_v2(x0b, xlb, u_w, v_w, bias))
    refb = cross_layer_v2_ref(x0b.astype(jnp.float32), xlb.astype(jnp.float32),
                              u_w, v_w, bias)
    assert jnp.allclose(outb.astype(jnp.float32), refb, atol=1e-1, rtol=1e-1)

    print("KERNEL_OK")
</pallas_src>

<mosaic_0001>
module attributes {stable_mosaic.version = 11 : i64} {
  func.func @_cross_kernel_folded(%arg0: i32, %arg1: memref<4x128xf32, #tpu.memory_space<vmem>>, %arg2: memref<4x128xf32, #tpu.memory_space<vmem>>, %arg3: memref<128x128xf32, #tpu.memory_space<vmem>>, %arg4: memref<1x128xf32, #tpu.memory_space<vmem>>, %arg5: memref<4x128xf32, #tpu.memory_space<vmem>>) attributes {dimension_semantics = [#tpu.dimension_semantics<parallel>], iteration_bounds = array<i64: 1>, scalar_prefetch = 0 : i64, scratch_operands = 0 : i64, tpu.core_type = #tpu.core_type<tc>, window_params = [{transform_indices = @transform_0, window_bounds = array<i64: 4, 128>}, {transform_indices = @transform_1, window_bounds = array<i64: 4, 128>}, {pipeline_mode = #tpu.pipeline_mode<synchronous>, transform_indices = @transform_2, window_bounds = array<i64: 128, 128>}, {pipeline_mode = #tpu.pipeline_mode<synchronous>, transform_indices = @transform_3, window_bounds = array<i64: 1, 128>}, {transform_indices = @transform_4, window_bounds = array<i64: 4, 128>}]} {
    %c0 = arith.constant 0 : index
    %c0_0 = arith.constant 0 : index
    %0 = vector.load %arg2[%c0, %c0_0] : memref<4x128xf32, #tpu.memory_space<vmem>>, vector<4x128xf32>
    %c0_1 = arith.constant 0 : index
    %c0_2 = arith.constant 0 : index
    %1 = vector.load %arg1[%c0_1, %c0_2] : memref<4x128xf32, #tpu.memory_space<vmem>>, vector<4x128xf32>
    %c0_3 = arith.constant 0 : index
    %c0_4 = arith.constant 0 : index
    %2 = vector.load %arg3[%c0_3, %c0_4] : memref<128x128xf32, #tpu.memory_space<vmem>>, vector<128x128xf32>
    %cst = arith.constant dense<0.000000e+00> : vector<4x128xf32>
    %3 = tpu.matmul %0, %2, %cst {dimension_numbers = #tpu.dot_dimension_numbers<[1], [0], [0], [1], [0, 0, 1, 1], [], []>, precision = #tpu.contract_precision<fp32>} : vector<4x128xf32>, vector<128x128xf32>, vector<4x128xf32> -> vector<4x128xf32>
    %4 = arith.mulf %1, %3 : vector<4x128xf32>
    %c0_5 = arith.constant 0 : index
    %c0_6 = arith.constant 0 : index
    %5 = vector.load %arg4[%c0_5, %c0_6] : memref<1x128xf32, #tpu.memory_space<vmem>>, vector<1x128xf32>
    %6 = vector.broadcast %5 : vector<1x128xf32> to vector<4x128xf32>
    %7 = arith.addf %4, %6 : vector<4x128xf32>
    %8 = arith.addf %7, %0 : vector<4x128xf32>
    %c0_7 = arith.constant 0 : index
    %c0_8 = arith.constant 0 : index
    %9 = vector.load %arg5[%c0_7, %c0_8] : memref<4x128xf32, #tpu.memory_space<vmem>>, vector<4x128xf32>
    tpu.vector_store %arg5[%c0_7, %c0_8], %8 {strides = array<i32>} : memref<4x128xf32, #tpu.memory_space<vmem>>, vector<4x128xf32>,
    return
  }
  func.func @transform_0(%arg0: i32) -> (i32, i32) {
    %c0_i32 = arith.constant 0 : i32
    %c0_i32_0 = arith.constant 0 : i32
    return %arg0, %c0_i32 : i32, i32
  }
  func.func @transform_1(%arg0: i32) -> (i32, i32) {
    %c0_i32 = arith.constant 0 : i32
    %c0_i32_0 = arith.constant 0 : i32
    return %arg0, %c0_i32 : i32, i32
  }
  func.func @transform_2(%arg0: i32) -> (i32, i32) {
    %c0_i32 = arith.constant 0 : i32
    %c0_i32_0 = arith.constant 0 : i32
    %c0_i32_1 = arith.constant 0 : i32
    return %c0_i32, %c0_i32_0 : i32, i32
  }
  func.func @transform_3(%arg0: i32) -> (i32, i32) {
    %c0_i32 = arith.constant 0 : i32
    %c0_i32_0 = arith.constant 0 : i32
    %c0_i32_1 = arith.constant 0 : i32
    return %c0_i32, %c0_i32_0 : i32, i32
  }
  func.func @transform_4(%arg0: i32) -> (i32, i32) {
    %c0_i32 = arith.constant 0 : i32
    %c0_i32_0 = arith.constant 0 : i32
    return %arg0, %c0_i32 : i32, i32
  }
}

module attributes {stable_mosaic.version = 11 : i64} {
  func.func @_cross_kernel_folded(%arg0: i32, %arg1: memref<4x128xf32, #tpu.memory_space<vmem>>, %arg2: memref<4x128xf32, #tpu.memory_space<vmem>>, %arg3: memref<128x128xf32, #tpu.memory_space<vmem>>, %arg4: memref<1x128xf32, #tpu.memory_space<vmem>>, %arg5: memref<4x128xf32, #tpu.memory_space<vmem>>) attributes {dimension_semantics = [#tpu.dimension_semantics<parallel>], iteration_bounds = array<i64: 1>, scalar_prefetch = 0 : i64, scratch_operands = 0 : i64, tpu.core_type = #tpu.core_type<tc>, window_params = [{transform_indices = @transform_0, window_bounds = array<i64: 4, 128>}, {transform_indices = @transform_1, window_bounds = array<i64: 4, 128>}, {pipeline_mode = #tpu.pipeline_mode<synchronous>, transform_indices = @transform_2, window_bounds = array<i64: 128, 128>}, {pipeline_mode = #tpu.pipeline_mode<synchronous>, transform_indices = @transform_3, window_bounds = array<i64: 1, 128>}, {transform_indices = @transform_4, window_bounds = array<i64: 4, 128>}]} {
    %c0 = arith.constant 0 : index
    %c0_0 = arith.constant 0 : index
    %0 = vector.load %arg2[%c0, %c0_0] : memref<4x128xf32, #tpu.memory_space<vmem>>, vector<4x128xf32>
    %c0_1 = arith.constant 0 : index
    %c0_2 = arith.constant 0 : index
    %1 = vector.load %arg1[%c0_1, %c0_2] : memref<4x128xf32, #tpu.memory_space<vmem>>, vector<4x128xf32>
    %c0_3 = arith.constant 0 : index
    %c0_4 = arith.constant 0 : index
    %2 = vector.load %arg3[%c0_3, %c0_4] : memref<128x128xf32, #tpu.memory_space<vmem>>, vector<128x128xf32>
    %cst = arith.constant dense<0.000000e+00> : vector<4x128xf32>
    %3 = tpu.matmul %0, %2, %cst {dimension_numbers = #tpu.dot_dimension_numbers<[1], [0], [0], [1], [0, 0, 1, 1], [], []>, precision = #tpu.contract_precision<fp32>} : vector<4x128xf32>, vector<128x128xf32>, vector<4x128xf32> -> vector<4x128xf32>
    %4 = arith.mulf %1, %3 : vector<4x128xf32>
    %c0_5 = arith.constant 0 : index
    %c0_6 = arith.constant 0 : index
    %5 = vector.load %arg4[%c0_5, %c0_6] : memref<1x128xf32, #tpu.memory_space<vmem>>, vector<1x128xf32>
    %6 = vector.broadcast %5 : vector<1x128xf32> to vector<4x128xf32>
    %7 = arith.addf %4, %6 : vector<4x128xf32>
    %8 = arith.addf %7, %0 : vector<4x128xf32>
    %c0_7 = arith.constant 0 : index
    %c0_8 = arith.constant 0 : index
    %9 = vector.load %arg5[%c0_7, %c0_8] : memref<4x128xf32, #tpu.memory_space<vmem>>, vector<4x128xf32>
    tpu.vector_store %arg5[%c0_7, %c0_8], %8 {strides = array<i32>} : memref<4x128xf32, #tpu.memory_space<vmem>>, vector<4x128xf32>,
    return
  }
  func.func @transform_0(%arg0: i32) -> (i32, i32) {
    %c0_i32 = arith.constant 0 : i32
    %c0_i32_0 = arith.constant 0 : i32
    return %arg0, %c0_i32 : i32, i32
  }
  func.func @transform_1(%arg0: i32) -> (i32, i32) {
    %c0_i32 = arith.constant 0 : i32
    %c0_i32_0 = arith.constant 0 : i32
    return %arg0, %c0_i32 : i32, i32
  }
  func.func @transform_2(%arg0: i32) -> (i32, i32) {
    %c0_i32 = arith.constant 0 : i32
    %c0_i32_0 = arith.constant 0 : i32
    %c0_i32_1 = arith.constant 0 : i32
    return %c0_i32, %c0_i32_0 : i32, i32
  }
  func.func @transform_3(%arg0: i32) -> (i32, i32) {
    %c0_i32 = arith.constant 0 : i32
    %c0_i32_0 = arith.constant 0 : i32
    %c0_i32_1 = arith.constant 0 : i32
    return %c0_i32, %c0_i32_0 : i32, i32
  }
  func.func @transform_4(%arg0: i32) -> (i32, i32) {
    %c0_i32 = arith.constant 0 : i32
    %c0_i32_0 = arith.constant 0 : i32
    return %arg0, %c0_i32 : i32, i32
  }
}

</mosaic_0001>

<bundles_post_ra>
// kernel: tpu_custom_call.1
= control target key start
LH: loop header
LB: loop body
LE: loop exit
PB: predicated region body
PF: predicated region fallthrough
CT: control target
= control target key end

     0   :  { %9 = vsyncpa [#allocation3], 0  ;;  %s1647_s0 = inlined_call_operand.hbm [shape: f32[4,128], index: 0, kind: input, shape index: {}]   ;;  %s1648_s1 = inlined_call_operand.hbm [shape: f32[4,128], index: 1, kind: input, shape index: {}]   ;;  %s1649_s2 = inlined_call_operand.hbm [shape: f32[128,128], index: 2, kind: input, shape index: {}]   ;;  %s1650_s3 = inlined_call_operand.vmem [shape: f32[1,128], index: 3, kind: input, shape index: {}]   ;;  %s1651_s4 = inlined_call_operand.hbm [shape: f32[4,128], index: 4, kind: output, shape index: {}]  }
   0x1   :  { %10 = vsyncpa [#allocation6], 0 }
   0x2   :  { %11 = vsyncpa [#allocation4], 0  ;;  %s1310_s15 = smov [#allocation5]   ;;  %s1311_s17 = smov [#allocation2]  }
   0x3   :  { %s28_s16 = sshll.u32 %s1310_s15, 4  ;;  %s18_s18 = sshll.u32 %s1311_s17, 4  ;;  %s29_s16 = int_to_ptr.vmem [resolvable:$true] %s28_s16  ;;  %s19_s18 = int_to_ptr.vmem [resolvable:$true] %s18_s18 }
   0x4   :  { %s1216_s21 = scalar_lea.hbm %s1648_s1, 64 }
   0x5   :  { %p1217_p0 = scmp.ne.s32.totalorder %s1648_s1, %s1216_s21  ;;  %p1220_p1 = scmp.lt.u32.totalorder %s1216_s21, %s1648_s1 }
   0x7   :  { %p1222_p2 = pnand %p1220_p1, %p1217_p0 }
   0x9   :  { %1225 = shalt.err (!%p1222_p2)
}
   0xa   :  { %s1226_s26 = scalar_lea.vmem %s29_s16, 64  ;;  %p1231_p4 = scmp.lt.s32.totalorder %s29_s16, %s29_s16 }
   0xb   :  { %p1227_p3 = scmp.ne.s32.totalorder %s29_s16, %s1226_s26  ;;  %p1232_p5 = scmp.lt.s32.totalorder %s1226_s26, %s1226_s26 }
   0xd   :  { %p1233_p6 = por %p1232_p5, %p1231_p4 }
   0xf   :  { %p1234_p7 = pnand %p1233_p6, %p1227_p3 }
  0x11   :  { %1237 = shalt.err (!%p1234_p7)
}
  0x12   :  { %31 = dma.hbm_to_vmem [thread:$0]  %s1648_s1, 64, %s29_s16, [#allocation6]  }
  0x13   :  { %s1238_s5 = scalar_lea.hbm %s1647_s0, 64 }
  0x14   :  { %p1239_p8 = scmp.ne.s32.totalorder %s1647_s0, %s1238_s5  ;;  %p1242_p9 = scmp.lt.u32.totalorder %s1238_s5, %s1647_s0 }
  0x16   :  { %p1244_p10 = pnand %p1242_p9, %p1239_p8 }
  0x18   :  { %1247 = shalt.err (!%p1244_p10)
}
  0x19   :  { %s1248_s10 = scalar_lea.vmem %s19_s18, 64  ;;  %p1253_p12 = scmp.lt.s32.totalorder %s19_s18, %s19_s18 }
  0x1a   :  { %p1249_p11 = scmp.ne.s32.totalorder %s19_s18, %s1248_s10  ;;  %p1254_p13 = scmp.lt.s32.totalorder %s1248_s10, %s1248_s10 }
  0x1c   :  { %p1255_p0 = por %p1254_p13, %p1253_p12 }
  0x1e   :  { %p1256_p1 = pnand %p1255_p0, %p1249_p11 }
  0x20   :  { %1259 = shalt.err (!%p1256_p1)
}
  0x21   :  { %21 = dma.hbm_to_vmem [thread:$0]  %s1647_s0, 64, %s19_s18, [#allocation3]  }
  0x22   :  { %s1312_s12 = smov [#allocation7]   ;;  %s1260_s16 = scalar_lea.hbm %s1649_s2, 2048 }
  0x23   :  { %s37_s13 = sshll.u32 %s1312_s12, 4  ;;  %p1261_p2 = scmp.ne.s32.totalorder %s1649_s2, %s1260_s16  ;;  %s38_s13 = int_to_ptr.vmem [resolvable:$true] %s37_s13 }
  0x24   :  { %p1264_p3 = scmp.lt.u32.totalorder %s1260_s16, %s1649_s2 }
  0x26   :  { %p1266_p4 = pnand %p1264_p3, %p1261_p2 }
  0x28   :  { %1269 = shalt.err (!%p1266_p4)
}
  0x29   :  { %s1270_s22 = scalar_lea.vmem %s38_s13, 2048  ;;  %p1275_p6 = scmp.lt.s32.totalorder %s38_s13, %s38_s13 }
  0x2a   :  { %p1271_p5 = scmp.ne.s32.totalorder %s38_s13, %s1270_s22  ;;  %p1276_p7 = scmp.lt.s32.totalorder %s1270_s22, %s1270_s22 }
  0x2c   :  { %p1277_p8 = por %p1276_p7, %p1275_p6 }
  0x2e   :  { %p1278_p9 = pnand %p1277_p8, %p1271_p5 }
  0x30   :  { %1281 = shalt.err (!%p1278_p9)
}
  0x31   :  { %s1313_s0 = smov 128   ;;  %s1314_s18 = smov 8  }
  0x32   :  { %43 = dma.hbm_to_vmem [thread:$0]  %s1649_s2, 2048, %s38_s13, [#allocation6], %s1313_s0, %s1313_s0, %s1314_s18  }
  0x33   :  { %1304 = dma.done.wait [#allocation3], 64  }
  0x34   :  { %1305 = vsyncadd [#allocation3], 4294967232 }
  0x35   :  { %1306 = dma.done.wait [#allocation6], 2112  }
  0x36   :  { %1307 = vsyncadd [#allocation6], 4294965184  ;;  %v1315_v0 = vmov 0.0|0.0   ;;  %vm1316_vm0 = vmmov 0   ;;  %v1317_v1 = vmov 0.0   ;;  %v57_v2 = vld [vmem:[#allocation7] sm:$0xff] }
  0x37   :  { %1054 = vmatprep.subr.bf16.mxu1 %v1315_v0  ;;  %1126 = vmatprep.subr.bf16.mxu0 %v1315_v0  ;;  %v58_v3 = vld [vmem:[#allocation7 + $0x8] sm:$0xff]  ;;  %v59_v4 = vld [vmem:[#allocation7 + $0x10] sm:$0xff]  ;;  %v74_v5 = vand.u32 4294901760, %v57_v2  ;;  %v60_v7 = vld [vmem:[#allocation7 + $0x18] sm:$0xff]  ;;  %s1318_s26 = smov [#allocation8]  }
  0x38   :  { %876 = vmatprep.mubr.msk.f32.mxu1 %vm1316_vm0, %v1317_v1  ;;  %981 = vmatprep.mubr.msk.f32.mxu0 %vm1316_vm0, %v1317_v1  ;;  %v77_v6 = vand.u32 4294901760, %v58_v3  ;;  %v80_v8 = vand.u32 4294901760, %v59_v4  ;;  %v83_v9 = vand.u32 4294901760, %v60_v7  ;;  %v61_v10 = vld [vmem:[#allocation7 + $0x20] sm:$0xff]  ;;  %v62_v11 = vld [vmem:[#allocation7 + $0x28] sm:$0xff]  ;;  %v63_v16 = vld [vmem:[#allocation7 + $0x30] sm:$0xff] }
  0x39   :  { %v86_v14 = vand.u32 4294901760, %v61_v10  ;;  %v89_v15 = vand.u32 4294901760, %v62_v11  ;;  %v64_v17 = vld [vmem:[#allocation7 + $0x38] sm:$0xff]  ;;  %v92_v19 = vand.u32 4294901760, %v63_v16  ;;  %v1400_v21 = vld [vmem:[#allocation7 + $0x40] sm:$0xff]  ;;  %v1402_v22 = vld [vmem:[#allocation7 + $0x48] sm:$0xff]  ;;  %v1418_v29 = vsub.f32 %v57_v2, %v74_v5 }
  0x3a   :  { %v1386_v12 = vpack.c.bf16 %v77_v6, %v74_v5  ;;  %v1390_v13 = vpack.c.bf16 %v83_v9, %v80_v8  ;;  %v95_v20 = vand.u32 4294901760, %v64_v17  ;;  %v98_v24 = vand.u32 4294901760, %v1400_v21  ;;  %v1410_v26 = vld [vmem:[#allocation5] sm:$0xf]  ;;  %v1414_v27 = vld [vmem:[#allocation7 + $0x50] sm:$0xff]  ;;  %v1431_v35 = vld [vmem:[#allocation7 + $0x60] sm:$0xff] }
  0x3b   :  { %v1396_v18 = vpack.c.bf16 %v89_v15, %v86_v14  ;;  %v101_v25 = vand.u32 4294901760, %v1402_v22  ;;  %v1416_v28 = vld [vmem:[#allocation7 + $0x58] sm:$0xff]  ;;  %v1421_v30 = vand.u32 4294901760, %v1410_v26  ;;  %v1423_v31 = vsub.f32 %v58_v3, %v77_v6  ;;  %v1435_v36 = vld [vmem:[#allocation7 + $0x68] sm:$0xff]  ;;  %v1455_v43 = vld [vmem:[#allocation7 + $0x70] sm:$0xff]  ;;  %s731_s27 = sshll.u32 %s1318_s26, 4  ;;  %s732_s27 = int_to_ptr.vmem [resolvable:$true] %s731_s27 }
  0x3c   :  { %1056 = vmatpush3.bf16.msra.mxu1 %v1386_v12  ;;  %1128 = vmatpush3.bf16.msra.mxu0 %v1386_v12  ;;  %v1406_v23 = vpack.c.bf16 %v95_v20, %v92_v19  ;;  %v104_v33 = vand.u32 4294901760, %v1414_v27  ;;  %v107_v34 = vand.u32 4294901760, %v1416_v28  ;;  %v1437_v37 = vsub.f32 %v59_v4, %v80_v8  ;;  %v1457_v44 = vld [vmem:[#allocation7 + $0x78] sm:$0xff]  ;;  %s1282_s28 = scalar_lea.vmem %s732_s27, 64  ;;  %p1287_p11 = scmp.lt.s32.totalorder %s732_s27, %s732_s27 }
  0x3d   :  { %1057 = vmatprep.subr.bf16.mxu1 %v1315_v0  ;;  %1129 = vmatprep.subr.bf16.mxu0 %v1315_v0  ;;  %v1427_v32 = vpack.c.bf16 %v101_v25, %v98_v24  ;;  %v1439_v38 = vsub.f32 %v60_v7, %v83_v9  ;;  %v110_v39 = vand.u32 4294901760, %v1431_v35  ;;  %v1444_v40 = vsub.f32 %v1410_v26, %v1421_v30  ;;  %p1283_p10 = scmp.ne.s32.totalorder %s732_s27, %s1282_s28  ;;  %p1288_p12 = scmp.lt.s32.totalorder %s1282_s28, %s1282_s28 }
  0x3e   :  { %v1452_v41 = vpack.c.bf16 %v107_v34, %v104_v33  ;;  %v113_v42 = vand.u32 4294901760, %v1435_v36  ;;  %v167_v45 = vand.u32 4294901760, %v1418_v29  ;;  %v174_v46 = vand.u32 4294901760, %v1423_v31 }
  0x3f   :  { %v1463_v47 = vsub.f32 %v61_v10, %v86_v14  ;;  %v1465_v48 = vsub.f32 %v62_v11, %v89_v15  ;;  %v116_v49 = vand.u32 4294901760, %v1455_v43  ;;  %v119_v50 = vand.u32 4294901760, %v1457_v44  ;;  %p1289_p13 = por %p1288_p12, %p1287_p11 }
  0x40   :  { %1059 = vmatpush3.bf16.msra.mxu1 %v1390_v13  ;;  %1131 = vmatpush3.bf16.msra.mxu0 %v1390_v13  ;;  %v156_v51 = vand.u32 4294901760, %v1444_v40  ;;  %v181_v52 = vand.u32 4294901760, %v1437_v37  ;;  %v1477_v53 = vpack.c.bf16 %v113_v42, %v110_v39  ;;  %v168_v54 = vsub.f32 %v1418_v29, %v167_v45 }
  0x41   :  { %1060 = vmatprep.subr.bf16.mxu1 %v1315_v0  ;;  %1132 = vmatprep.subr.bf16.mxu0 %v1315_v0  ;;  %v175_v55 = vsub.f32 %v1423_v31, %v174_v46  ;;  %v188_v56 = vand.u32 4294901760, %v1439_v38  ;;  %v1484_v57 = vsub.f32 %v63_v16, %v92_v19  ;;  %v1486_v58 = vsub.f32 %v64_v17, %v95_v20  ;;  %p1290_p0 = pnand %p1289_p13, %p1283_p10 }
  0x42   :  { %v157_v59 = vsub.f32 %v1444_v40, %v156_v51  ;;  %v182_v60 = vsub.f32 %v1437_v37, %v181_v52  ;;  %v195_v61 = vand.u32 4294901760, %v1463_v47  ;;  %v202_v62 = vand.u32 4294901760, %v1465_v48 }
  0x43   :  { %v1498_v63 = vpack.c.bf16 %v119_v50, %v116_v49  ;;  %v169_v2 = vand.u32 4294901760, %v168_v54  ;;  %v176_v3 = vand.u32 4294901760, %v175_v55  ;;  %v189_v4 = vsub.f32 %v1439_v38, %v188_v56 }
  0x44   :  { %1062 = vmatpush3.bf16.msra.mxu1 %v1396_v18  ;;  %1134 = vmatpush3.bf16.msra.mxu0 %v1396_v18  ;;  %v1504_v5 = vsub.f32 %v1400_v21, %v98_v24  ;;  %v1507_v6 = vsub.f32 %v1402_v22, %v101_v25  ;;  %v1151_v7 = vpack.c.bf16 %v174_v46, %v167_v45  ;;  %v158_v8 = vand.u32 4294901760, %v157_v59 }
  0x45   :  { %1063 = vmatprep.subr.bf16.mxu1 %v1315_v0  ;;  %1135 = vmatprep.subr.bf16.mxu0 %v1315_v0  ;;  %v183_v9 = vand.u32 4294901760, %v182_v60  ;;  %v196_v10 = vsub.f32 %v1463_v47, %v195_v61  ;;  %v203_v11 = vsub.f32 %v1465_v48, %v202_v62  ;;  %v1079_v14 = vpack.c.bf16 %v176_v3, %v169_v2 }
  0x46   :  { %v190_v15 = vand.u32 4294901760, %v189_v4  ;;  %v209_v16 = vand.u32 4294901760, %v1484_v57  ;;  %v216_v17 = vand.u32 4294901760, %v1486_v58  ;;  %v1520_v19 = vsub.f32 %v1414_v27, %v104_v33 }
  0x47   :  { %v1525_v20 = vsub.f32 %v1416_v28, %v107_v34  ;;  %v1154_v21 = vpack.c.bf16 %v188_v56, %v181_v52  ;;  %v197_v22 = vand.u32 4294901760, %v196_v10  ;;  %v204_v24 = vand.u32 4294901760, %v203_v11 }
  0x48   :  { %1065 = vmatpush3.bf16.msra.mxu1 %v1406_v23  ;;  %1137 = vmatpush3.bf16.msra.mxu0 %v1406_v23  ;;  %v223_v25 = vand.u32 4294901760, %v1504_v5  ;;  %v1082_v45 = vpack.c.bf16 %v190_v15, %v183_v9  ;;  %v210_v46 = vsub.f32 %v1484_v57, %v209_v16  ;;  %v217_v27 = vsub.f32 %v1486_v58, %v216_v17 }
  0x49   :  { %1066 = vmatprep.subr.bf16.mxu1 %v1315_v0  ;;  %1138 = vmatprep.subr.bf16.mxu0 %v1315_v0  ;;  %v230_v33 = vand.u32 4294901760, %v1507_v6  ;;  %v1536_v28 = vsub.f32 %v1431_v35, %v110_v39  ;;  %v1541_v34 = vsub.f32 %v1435_v36, %v113_v42  ;;  %v1157_v52 = vpack.c.bf16 %v202_v62, %v195_v61 }
  0x4a   :  { %v224_v54 = vsub.f32 %v1504_v5, %v223_v25  ;;  %v237_v55 = vand.u32 4294901760, %v1520_v19  ;;  %v211_v35 = vand.u32 4294901760, %v210_v46  ;;  %v218_v39 = vand.u32 4294901760, %v217_v27 }
  0x4b   :  { %v231_v56 = vsub.f32 %v1507_v6, %v230_v33  ;;  %v244_v36 = vand.u32 4294901760, %v1525_v20  ;;  %v1556_v42 = vsub.f32 %v1455_v43, %v116_v49  ;;  %v1561_v59 = vsub.f32 %v1457_v44, %v119_v50 }
  0x4c   :  { %1068 = vmatpush3.bf16.msra.mxu1 %v1427_v32  ;;  %1140 = vmatpush3.bf16.msra.mxu0 %v1427_v32  ;;  %v1160_v60 = vpack.c.bf16 %v216_v17, %v209_v16  ;;  %v225_v61 = vand.u32 4294901760, %v224_v54  ;;  %v238_v62 = vsub.f32 %v1520_v19, %v237_v55  ;;  %v251_v2 = vand.u32 4294901760, %v1536_v28 }
  0x4d   :  { %1069 = vmatprep.subr.bf16.mxu1 %v1315_v0  ;;  %1141 = vmatprep.subr.bf16.mxu0 %v1315_v0  ;;  %v1088_v3 = vpack.c.bf16 %v218_v39, %v211_v35  ;;  %v232_v4 = vand.u32 4294901760, %v231_v56  ;;  %v258_v43 = vand.u32 4294901760, %v1541_v34  ;;  %v1163_v44 = vpack.c.bf16 %v230_v33, %v223_v25 }
  0x4e   :  { %v239_v49 = vand.u32 4294901760, %v238_v62  ;;  %v252_v50 = vsub.f32 %v1536_v28, %v251_v2  ;;  %v1166_v15 = vpack.c.bf16 %v244_v36, %v237_v55  ;;  %v1106_v54 = vpack.c.bf16 %v1439_v38, %v1437_v37 }
  0x4f   :  { %v1091_v9 = vpack.c.bf16 %v232_v4, %v225_v61  ;;  %v259_v11 = vsub.f32 %v1541_v34, %v258_v43 }
  0x50   :  { %1071 = vmatpush3.bf16.msra.mxu1 %v1452_v41  ;;  %1143 = vmatpush3.bf16.msra.mxu0 %v1452_v41  ;;  %v253_v16 = vand.u32 4294901760, %v252_v50 }
  0x51   :  { %1072 = vmatprep.subr.bf16.mxu1 %v1315_v0  ;;  %1144 = vmatprep.subr.bf16.mxu0 %v1315_v0 }
  0x54   :  { %1074 = vmatpush3.bf16.msra.mxu1 %v1477_v53  ;;  %1146 = vmatpush3.bf16.msra.mxu0 %v1477_v53 }
  0x55   :  { %1075 = vmatprep.subr.bf16.mxu1 %v1315_v0  ;;  %1147 = vmatprep.subr.bf16.mxu0 %v1315_v0 }
  0x58   :  { %1077 = vmatpush3.bf16.msra.mxu1 %v1498_v63  ;;  %1149 = vmatpush3.bf16.msra.mxu0 %v1498_v63 }
  0x59   :  { %1078 = vmatprep.subr.bf16.mxu1 %v1315_v0  ;;  %1150 = vmatprep.subr.bf16.mxu0 %v1315_v0 }
  0x5b   :  { %877 = vmatmul.mubr.f32.vlgmr.msra.gmra.mrb[0].mxu1 %v158_v8  ;;  %982 = vmatmul.mubr.f32.vlgmr.msra.gmra.mrb[0].mxu0 %v156_v51  ;;  %v1085_v51 = vpack.c.bf16 %v204_v24, %v197_v22  ;;  %v265_v8 = vand.u32 4294901760, %v1556_v42 }
  0x5c   :  { %1080 = vmatpush3.bf16.msra.mxu1 %v1079_v14  ;;  %1152 = vmatpush3.bf16.msra.mxu0 %v1151_v7  ;;  %v245_v7 = vsub.f32 %v1525_v20, %v244_v36  ;;  %v272_v14 = vand.u32 4294901760, %v1561_v59 }
  0x5d   :  { %1081 = vmatprep.subr.bf16.mxu1 %v1315_v0  ;;  %1153 = vmatprep.subr.bf16.mxu0 %v1315_v0  ;;  %v266_v22 = vsub.f32 %v1556_v42, %v265_v8 }
  0x5e   :  { %911 = vmatprep.mubr.msk.f32.mxu1 %vm1316_vm0, %v1317_v1  ;;  %1016 = vmatprep.mubr.msk.f32.mxu0 %vm1316_vm0, %v1317_v1  ;;  %v246_v10 = vand.u32 4294901760, %v245_v7  ;;  %v273_v24 = vsub.f32 %v1561_v59, %v272_v14 }
  0x5f   :  { %v267_v46 = vand.u32 4294901760, %v266_v22 }
  0x60   :  { %1083 = vmatpush3.bf16.msra.mxu1 %v1082_v45  ;;  %1155 = vmatpush3.bf16.msra.mxu0 %v1154_v21  ;;  %v1094_v17 = vpack.c.bf16 %v246_v10, %v239_v49  ;;  %v260_v21 = vand.u32 4294901760, %v259_v11  ;;  %v1169_v45 = vpack.c.bf16 %v258_v43, %v251_v2  ;;  %v274_v27 = vand.u32 4294901760, %v273_v24 }
  0x61   :  { %1084 = vmatprep.subr.bf16.mxu1 %v1315_v0  ;;  %1156 = vmatprep.subr.bf16.mxu0 %v1315_v0 }
  0x62   :  { %v1097_v25 = vpack.c.bf16 %v260_v21, %v253_v16  ;;  %v1100_v33 = vpack.c.bf16 %v274_v27, %v267_v46 }
  0x64   :  { %1086 = vmatpush3.bf16.msra.mxu1 %v1085_v51  ;;  %1158 = vmatpush3.bf16.msra.mxu0 %v1157_v52  ;;  %v1172_v51 = vpack.c.bf16 %v272_v14, %v265_v8  ;;  %v1103_v52 = vpack.c.bf16 %v1423_v31, %v1418_v29  ;;  %v1109_v29 = vpack.c.bf16 %v1465_v48, %v1463_v47  ;;  %v741_v48 = vld [vmem:[%s1650_s3] ss:$0 sm:$0xff] }
  0x65   :  { %1087 = vmatprep.subr.bf16.mxu1 %v1315_v0  ;;  %1159 = vmatprep.subr.bf16.mxu0 %v1315_v0 }
  0x68   :  { %1089 = vmatpush3.bf16.msra.mxu1 %v1088_v3  ;;  %1161 = vmatpush3.bf16.msra.mxu0 %v1160_v60 }
  0x69   :  { %1090 = vmatprep.subr.bf16.mxu1 %v1315_v0  ;;  %1162 = vmatprep.subr.bf16.mxu0 %v1315_v0 }
  0x6c   :  { %1092 = vmatpush3.bf16.msra.mxu1 %v1091_v9  ;;  %1164 = vmatpush3.bf16.msra.mxu0 %v1163_v44 }
  0x6d   :  { %1093 = vmatprep.subr.bf16.mxu1 %v1315_v0  ;;  %1165 = vmatprep.subr.bf16.mxu0 %v1315_v0 }
  0x70   :  { %1095 = vmatpush3.bf16.msra.mxu1 %v1094_v17  ;;  %1167 = vmatpush3.bf16.msra.mxu0 %v1166_v15 }
  0x71   :  { %1096 = vmatprep.subr.bf16.mxu1 %v1315_v0  ;;  %1168 = vmatprep.subr.bf16.mxu0 %v1315_v0 }
  0x74   :  { %1098 = vmatpush3.bf16.msra.mxu1 %v1097_v25  ;;  %1170 = vmatpush3.bf16.msra.mxu0 %v1169_v45 }
  0x75   :  { %1099 = vmatprep.subr.bf16.mxu1 %v1315_v0  ;;  %1171 = vmatprep.subr.bf16.mxu0 %v1315_v0 }
  0x78   :  { %1101 = vmatpush3.bf16.msra.mxu1 %v1100_v33  ;;  %1173 = vmatpush3.bf16.msra.mxu0 %v1172_v51 }
  0x79   :  { %1102 = vmatprep.subr.bf16.mxu1 %v1315_v0  ;;  %1174 = vmatprep.subr.bf16.mxu0 %v1315_v0 }
  0x7b   :  { %912 = vmatmul.mubr.f32.vlgmr.msra.gmra.mrb[0].mxu1 %v1421_v30  ;;  %1017 = vmatmul.mubr.f32.vlgmr.msra.gmra.mrb[0].mxu0 %v1421_v30 }
  0x7c   :  { %1104 = vmatpush3.bf16.msra.mxu1 %v1103_v52  ;;  %1176 = vmatpush3.bf16.msra.mxu0 %v1386_v12  ;;  %v1112_v12 = vpack.c.bf16 %v1486_v58, %v1484_v57 }
  0x7d   :  { %1105 = vmatprep.subr.bf16.mxu1 %v1315_v0  ;;  %1177 = vmatprep.subr.bf16.mxu0 %v1315_v0 }
  0x7e   :  { %946 = vmatprep.mubr.msk.f32.mxu1 %vm1316_vm0, %v1317_v1  ;;  %1051 = vmatprep.mubr.msk.f32.mxu0 %vm1316_vm0, %v1317_v1  ;;  %v1115_v1 = vpack.c.bf16 %v1507_v6, %v1504_v5 }
  0x80   :  { %1107 = vmatpush3.bf16.msra.mxu1 %v1106_v54  ;;  %1179 = vmatpush3.bf16.msra.mxu0 %v1390_v13  ;;  %v1118_v13 = vpack.c.bf16 %v1525_v20, %v1520_v19 }
  0x81   :  { %1108 = vmatprep.subr.bf16.mxu1 %v1315_v0  ;;  %1180 = vmatprep.subr.bf16.mxu0 %v1315_v0 }
  0x84   :  { %1110 = vmatpush3.bf16.msra.mxu1 %v1109_v29  ;;  %1182 = vmatpush3.bf16.msra.mxu0 %v1396_v18  ;;  %v1121_v18 = vpack.c.bf16 %v1541_v34, %v1536_v28 }
  0x85   :  { %1111 = vmatprep.subr.bf16.mxu1 %v1315_v0  ;;  %1183 = vmatprep.subr.bf16.mxu0 %v1315_v0 }
  0x88   :  { %1113 = vmatpush3.bf16.msra.mxu1 %v1112_v12  ;;  %1185 = vmatpush3.bf16.msra.mxu0 %v1406_v23  ;;  %v1124_v23 = vpack.c.bf16 %v1561_v59, %v1556_v42 }
  0x89   :  { %1114 = vmatprep.subr.bf16.mxu1 %v1315_v0  ;;  %1186 = vmatprep.subr.bf16.mxu0 %v1315_v0 }
  0x8c   :  { %1116 = vmatpush3.bf16.msra.mxu1 %v1115_v1  ;;  %1188 = vmatpush3.bf16.msra.mxu0 %v1427_v32  ;;  %v56_v32 = vld [vmem:[#allocation2] sm:$0xf] }
  0x8d   :  { %1117 = vmatprep.subr.bf16.mxu1 %v1315_v0  ;;  %1189 = vmatprep.subr.bf16.mxu0 %v1315_v0 }
  0x90   :  { %1119 = vmatpush3.bf16.msra.mxu1 %v1118_v13  ;;  %1191 = vmatpush3.bf16.msra.mxu0 %v1452_v41 }
  0x91   :  { %1120 = vmatprep.subr.bf16.mxu1 %v1315_v0  ;;  %1192 = vmatprep.subr.bf16.mxu0 %v1315_v0 }
  0x94   :  { %1122 = vmatpush3.bf16.msra.mxu1 %v1121_v18  ;;  %1194 = vmatpush3.bf16.msra.mxu0 %v1477_v53 }
  0x95   :  { %1123 = vmatprep.subr.bf16.mxu1 %v1315_v0  ;;  %1195 = vmatprep.subr.bf16.mxu0 %v1315_v0 }
  0x98   :  { %1125 = vmatpush3.bf16.msra.mxu1 %v1124_v23  ;;  %1197 = vmatpush3.bf16.msra.mxu0 %v1498_v63 }
  0x9b   :  { %947 = vmatmul.mubr.f32.vlgmr.msra.gmra.mrb[0].mxu1 %v1444_v40  ;;  %1052 = vmatmul.mubr.f32.vlgmr.msra.gmra.mrb[0].mxu0 %v1421_v30 }
 0x16e   :  { %v415_v31 = vpop.f32.mrb[0].mxu1  ;;  %v710_v37 = vpop.f32.mrb[0].mxu0 }
 0x16f   :  { %v1198_v38 = vadd.f32 %v710_v37, %v415_v31  ;;  %v948_v41 = vpop.f32.mrb[1].mxu1  ;;  %v1053_v47 = vpop.f32.mrb[1].mxu0 }
 0x171   :  { %v714_v53 = vmul.f32 %v1198_v38, %v56_v32 }
 0x173   :  { %v722_v0 = vadd.f32 %v741_v48, %v714_v53 }
 0x175   :  { %v723_v57 = vadd.f32 %v722_v0, %v1410_v26 }
 0x177   :  { %724 = vst [vmem:[#allocation8] sm:$0xf] %v723_v57 }
 0x178   :  { %1293 = shalt.err (!%p1290_p0)
}
 0x179   :  { %s1294_s5 = scalar_lea.hbm %s1651_s4, 64 }
 0x17a   :  { %p1295_p1 = scmp.ne.s32.totalorder %s1651_s4, %s1294_s5  ;;  %p1298_p2 = scmp.lt.u32.totalorder %s1294_s5, %s1651_s4 }
 0x17c   :  { %p1300_p3 = pnand %p1298_p2, %p1295_p1 }
 0x17e   :  { %1303 = shalt.err (!%p1300_p3)
}
 0x17f   :  { %734 = dma.vmem_to_hbm [thread:$0]  %s732_s27, 64, %s1651_s4, [#allocation4]  }
 0x180   :  { %1308 = dma.done.wait [#allocation4], 64  }
 0x181   :  { %1309 = vsyncadd [#allocation4], 4294967232 }
 0x182   :  { %738 = vsyncpa [#allocation3], 1 }
 0x183   :  { %739 = vsyncpa [#allocation6], 1 }
 0x184   :  { %740 = vsyncpa [#allocation4], 1 }

// kernel: tpu_custom_call.1
= control target key start
LH: loop header
LB: loop body
LE: loop exit
PB: predicated region body
PF: predicated region fallthrough
CT: control target
= control target key end

     0   :  { %9 = vsyncpa [#allocation3], 0  ;;  %s1647_s0 = inlined_call_operand.hbm [shape: f32[4,128], index: 0, kind: input, shape index: {}]   ;;  %s1648_s1 = inlined_call_operand.hbm [shape: f32[4,128], index: 1, kind: input, shape index: {}]   ;;  %s1649_s2 = inlined_call_operand.hbm [shape: f32[128,128], index: 2, kind: input, shape index: {}]   ;;  %s1650_s3 = inlined_call_operand.vmem [shape: f32[1,128], index: 3, kind: input, shape index: {}]   ;;  %s1651_s4 = inlined_call_operand.hbm [shape: f32[4,128], index: 4, kind: output, shape index: {}]  }
   0x1   :  { %10 = vsyncpa [#allocation6], 0 }
   0x2   :  { %11 = vsyncpa [#allocation4], 0  ;;  %s1310_s15 = smov [#allocation5]   ;;  %s1311_s17 = smov [#allocation2]  }
   0x3   :  { %s28_s16 = sshll.u32 %s1310_s15, 4  ;;  %s18_s18 = sshll.u32 %s1311_s17, 4  ;;  %s29_s16 = int_to_ptr.vmem [resolvable:$true] %s28_s16  ;;  %s19_s18 = int_to_ptr.vmem [resolvable:$true] %s18_s18 }
   0x4   :  { %s1216_s21 = scalar_lea.hbm %s1648_s1, 64 }
   0x5   :  { %p1217_p0 = scmp.ne.s32.totalorder %s1648_s1, %s1216_s21  ;;  %p1220_p1 = scmp.lt.u32.totalorder %s1216_s21, %s1648_s1 }
   0x7   :  { %p1222_p2 = pnand %p1220_p1, %p1217_p0 }
   0x9   :  { %1225 = shalt.err (!%p1222_p2)
}
   0xa   :  { %s1226_s26 = scalar_lea.vmem %s29_s16, 64  ;;  %p1231_p4 = scmp.lt.s32.totalorder %s29_s16, %s29_s16 }
   0xb   :  { %p1227_p3 = scmp.ne.s32.totalorder %s29_s16, %s1226_s26  ;;  %p1232_p5 = scmp.lt.s32.totalorder %s1226_s26, %s1226_s26 }
   0xd   :  { %p1233_p6 = por %p1232_p5, %p1231_p4 }
   0xf   :  { %p1234_p7 = pnand %p1233_p6, %p1227_p3 }
  0x11   :  { %1237 = shalt.err (!%p1234_p7)
}
  0x12   :  { %31 = dma.hbm_to_vmem [thread:$0]  %s1648_s1, 64, %s29_s16, [#allocation6]  }
  0x13   :  { %s1238_s5 = scalar_lea.hbm %s1647_s0, 64 }
  0x14   :  { %p1239_p8 = scmp.ne.s32.totalorder %s1647_s0, %s1238_s5  ;;  %p1242_p9 = scmp.lt.u32.totalorder %s1238_s5, %s1647_s0 }
  0x16   :  { %p1244_p10 = pnand %p1242_p9, %p1239_p8 }
  0x18   :  { %1247 = shalt.err (!%p1244_p10)
}
  0x19   :  { %s1248_s10 = scalar_lea.vmem %s19_s18, 64  ;;  %p1253_p12 = scmp.lt.s32.totalorder %s19_s18, %s19_s18 }
  0x1a   :  { %p1249_p11 = scmp.ne.s32.totalorder %s19_s18, %s1248_s10  ;;  %p1254_p13 = scmp.lt.s32.totalorder %s1248_s10, %s1248_s10 }
  0x1c   :  { %p1255_p0 = por %p1254_p13, %p1253_p12 }
  0x1e   :  { %p1256_p1 = pnand %p1255_p0, %p1249_p11 }
  0x20   :  { %1259 = shalt.err (!%p1256_p1)
}
  0x21   :  { %21 = dma.hbm_to_vmem [thread:$0]  %s1647_s0, 64, %s19_s18, [#allocation3]  }
  0x22   :  { %s1312_s12 = smov [#allocation7]   ;;  %s1260_s16 = scalar_lea.hbm %s1649_s2, 2048 }
  0x23   :  { %s37_s13 = sshll.u32 %s1312_s12, 4  ;;  %p1261_p2 = scmp.ne.s32.totalorder %s1649_s2, %s1260_s16  ;;  %s38_s13 = int_to_ptr.vmem [resolvable:$true] %s37_s13 }
  0x24   :  { %p1264_p3 = scmp.lt.u32.totalorder %s1260_s16, %s1649_s2 }
  0x26   :  { %p1266_p4 = pnand %p1264_p3, %p1261_p2 }
  0x28   :  { %1269 = shalt.err (!%p1266_p4)
}
  0x29   :  { %s1270_s22 = scalar_lea.vmem %s38_s13, 2048  ;;  %p1275_p6 = scmp.lt.s32.totalorder %s38_s13, %s38_s13 }
  0x2a   :  { %p1271_p5 = scmp.ne.s32.totalorder %s38_s13, %s1270_s22  ;;  %p1276_p7 = scmp.lt.s32.totalorder %s1270_s22, %s1270_s22 }
  0x2c   :  { %p1277_p8 = por %p1276_p7, %p1275_p6 }
  0x2e   :  { %p1278_p9 = pnand %p1277_p8, %p1271_p5 }
  0x30   :  { %1281 = shalt.err (!%p1278_p9)
}
  0x31   :  { %s1313_s0 = smov 128   ;;  %s1314_s18 = smov 8  }
  0x32   :  { %43 = dma.hbm_to_vmem [thread:$0]  %s1649_s2, 2048, %s38_s13, [#allocation6], %s1313_s0, %s1313_s0, %s1314_s18  }
  0x33   :  { %1304 = dma.done.wait [#allocation3], 64  }
  0x34   :  { %1305 = vsyncadd [#allocation3], 4294967232 }
  0x35   :  { %1306 = dma.done.wait [#allocation6], 2112  }
  0x36   :  { %1307 = vsyncadd [#allocation6], 4294965184  ;;  %v1315_v0 = vmov 0.0|0.0   ;;  %vm1316_vm0 = vmmov 0   ;;  %v1317_v1 = vmov 0.0   ;;  %v57_v2 = vld [vmem:[#allocation7] sm:$0xff] }
  0x37   :  { %1054 = vmatprep.subr.bf16.mxu1 %v1315_v0  ;;  %1126 = vmatprep.subr.bf16.mxu0 %v1315_v0  ;;  %v58_v3 = vld [vmem:[#allocation7 + $0x8] sm:$0xff]  ;;  %v59_v4 = vld [vmem:[#allocation7 + $0x10] sm:$0xff]  ;;  %v74_v5 = vand.u32 4294901760, %v57_v2  ;;  %v60_v7 = vld [vmem:[#allocation7 + $0x18] sm:$0xff]  ;;  %s1318_s26 = smov [#allocation8]  }
  0x38   :  { %876 = vmatprep.mubr.msk.f32.mxu1 %vm1316_vm0, %v1317_v1  ;;  %981 = vmatprep.mubr.msk.f32.mxu0 %vm1316_vm0, %v1317_v1  ;;  %v77_v6 = vand.u32 4294901760, %v58_v3  ;;  %v80_v8 = vand.u32 4294901760, %v59_v4  ;;  %v83_v9 = vand.u32 4294901760, %v60_v7  ;;  %v61_v10 = vld [vmem:[#allocation7 + $0x20] sm:$0xff]  ;;  %v62_v11 = vld [vmem:[#allocation7 + $0x28] sm:$0xff]  ;;  %v63_v16 = vld [vmem:[#allocation7 + $0x30] sm:$0xff] }
  0x39   :  { %v86_v14 = vand.u32 4294901760, %v61_v10  ;;  %v89_v15 = vand.u32 4294901760, %v62_v11  ;;  %v64_v17 = vld [vmem:[#allocation7 + $0x38] sm:$0xff]  ;;  %v92_v19 = vand.u32 4294901760, %v63_v16  ;;  %v1400_v21 = vld [vmem:[#allocation7 + $0x40] sm:$0xff]  ;;  %v1402_v22 = vld [vmem:[#allocation7 + $0x48] sm:$0xff]  ;;  %v1418_v29 = vsub.f32 %v57_v2, %v74_v5 }
  0x3a   :  { %v1386_v12 = vpack.c.bf16 %v77_v6, %v74_v5  ;;  %v1390_v13 = vpack.c.bf16 %v83_v9, %v80_v8  ;;  %v95_v20 = vand.u32 4294901760, %v64_v17  ;;  %v98_v24 = vand.u32 4294901760, %v1400_v21  ;;  %v1410_v26 = vld [vmem:[#allocation5] sm:$0xf]  ;;  %v1414_v27 = vld [vmem:[#allocation7 + $0x50] sm:$0xff]  ;;  %v1431_v35 = vld [vmem:[#allocation7 + $0x60] sm:$0xff] }
  0x3b   :  { %v1396_v18 = vpack.c.bf16 %v89_v15, %v86_v14  ;;  %v101_v25 = vand.u32 4294901760, %v1402_v22  ;;  %v1416_v28 = vld [vmem:[#allocation7 + $0x58] sm:$0xff]  ;;  %v1421_v30 = vand.u32 4294901760, %v1410_v26  ;;  %v1423_v31 = vsub.f32 %v58_v3, %v77_v6  ;;  %v1435_v36 = vld [vmem:[#allocation7 + $0x68] sm:$0xff]  ;;  %v1455_v43 = vld [vmem:[#allocation7 + $0x70] sm:$0xff]  ;;  %s731_s27 = sshll.u32 %s1318_s26, 4  ;;  %s732_s27 = int_to_ptr.vmem [resolvable:$true] %s731_s27 }
  0x3c   :  { %1056 = vmatpush3.bf16.msra.mxu1 %v1386_v12  ;;  %1128 = vmatpush3.bf16.msra.mxu0 %v1386_v12  ;;  %v1406_v23 = vpack.c.bf16 %v95_v20, %v92_v19  ;;  %v104_v33 = vand.u32 4294901760, %v1414_v27  ;;  %v107_v34 = vand.u32 4294901760, %v1416_v28  ;;  %v1437_v37 = vsub.f32 %v59_v4, %v80_v8  ;;  %v1457_v44 = vld [vmem:[#allocation7 + $0x78] sm:$0xff]  ;;  %s1282_s28 = scalar_lea.vmem %s732_s27, 64  ;;  %p1287_p11 = scmp.lt.s32.totalorder %s732_s27, %s732_s27 }
  0x3d   :  { %1057 = vmatprep.subr.bf16.mxu1 %v1315_v0  ;;  %1129 = vmatprep.subr.bf16.mxu0 %v1315_v0  ;;  %v1427_v32 = vpack.c.bf16 %v101_v25, %v98_v24  ;;  %v1439_v38 = vsub.f32 %v60_v7, %v83_v9  ;;  %v110_v39 = vand.u32 4294901760, %v1431_v35  ;;  %v1444_v40 = vsub.f32 %v1410_v26, %v1421_v30  ;;  %p1283_p10 = scmp.ne.s32.totalorder %s732_s27, %s1282_s28  ;;  %p1288_p12 = scmp.lt.s32.totalorder %s1282_s28, %s1282_s28 }
  0x3e   :  { %v1452_v41 = vpack.c.bf16 %v107_v34, %v104_v33  ;;  %v113_v42 = vand.u32 4294901760, %v1435_v36  ;;  %v167_v45 = vand.u32 4294901760, %v1418_v29  ;;  %v174_v46 = vand.u32 4294901760, %v1423_v31 }
  0x3f   :  { %v1463_v47 = vsub.f32 %v61_v10, %v86_v14  ;;  %v1465_v48 = vsub.f32 %v62_v11, %v89_v15  ;;  %v116_v49 = vand.u32 4294901760, %v1455_v43  ;;  %v119_v50 = vand.u32 4294901760, %v1457_v44  ;;  %p1289_p13 = por %p1288_p12, %p1287_p11 }
  0x40   :  { %1059 = vmatpush3.bf16.msra.mxu1 %v1390_v13  ;;  %1131 = vmatpush3.bf16.msra.mxu0 %v1390_v13  ;;  %v156_v51 = vand.u32 4294901760, %v1444_v40  ;;  %v181_v52 = vand.u32 4294901760, %v1437_v37  ;;  %v1477_v53 = vpack.c.bf16 %v113_v42, %v110_v39  ;;  %v168_v54 = vsub.f32 %v1418_v29, %v167_v45 }
  0x41   :  { %1060 = vmatprep.subr.bf16.mxu1 %v1315_v0  ;;  %1132 = vmatprep.subr.bf16.mxu0 %v1315_v0  ;;  %v175_v55 = vsub.f32 %v1423_v31, %v174_v46  ;;  %v188_v56 = vand.u32 4294901760, %v1439_v38  ;;  %v1484_v57 = vsub.f32 %v63_v16, %v92_v19  ;;  %v1486_v58 = vsub.f32 %v64_v17, %v95_v20  ;;  %p1290_p0 = pnand %p1289_p13, %p1283_p10 }
  0x42   :  { %v157_v59 = vsub.f32 %v1444_v40, %v156_v51  ;;  %v182_v60 = vsub.f32 %v1437_v37, %v181_v52  ;;  %v195_v61 = vand.u32 4294901760, %v1463_v47  ;;  %v202_v62 = vand.u32 4294901760, %v1465_v48 }
  0x43   :  { %v1498_v63 = vpack.c.bf16 %v119_v50, %v116_v49  ;;  %v169_v2 = vand.u32 4294901760, %v168_v54  ;;  %v176_v3 = vand.u32 4294901760, %v175_v55  ;;  %v189_v4 = vsub.f32 %v1439_v38, %v188_v56 }
  0x44   :  { %1062 = vmatpush3.bf16.msra.mxu1 %v1396_v18  ;;  %1134 = vmatpush3.bf16.msra.mxu0 %v1396_v18  ;;  %v1504_v5 = vsub.f32 %v1400_v21, %v98_v24  ;;  %v1507_v6 = vsub.f32 %v1402_v22, %v101_v25  ;;  %v1151_v7 = vpack.c.bf16 %v174_v46, %v167_v45  ;;  %v158_v8 = vand.u32 4294901760, %v157_v59 }
  0x45   :  { %1063 = vmatprep.subr.bf16.mxu1 %v1315_v0  ;;  %1135 = vmatprep.subr.bf16.mxu0 %v1315_v0  ;;  %v183_v9 = vand.u32 4294901760, %v182_v60  ;;  %v196_v10 = vsub.f32 %v1463_v47, %v195_v61  ;;  %v203_v11 = vsub.f32 %v1465_v48, %v202_v62  ;;  %v1079_v14 = vpack.c.bf16 %v176_v3, %v169_v2 }
  0x46   :  { %v190_v15 = vand.u32 4294901760, %v189_v4  ;;  %v209_v16 = vand.u32 4294901760, %v1484_v57  ;;  %v216_v17 = vand.u32 4294901760, %v1486_v58  ;;  %v1520_v19 = vsub.f32 %v1414_v27, %v104_v33 }
  0x47   :  { %v1525_v20 = vsub.f32 %v1416_v28, %v107_v34  ;;  %v1154_v21 = vpack.c.bf16 %v188_v56, %v181_v52  ;;  %v197_v22 = vand.u32 4294901760, %v196_v10  ;;  %v204_v24 = vand.u32 4294901760, %v203_v11 }
  0x48   :  { %1065 = vmatpush3.bf16.msra.mxu1 %v1406_v23  ;;  %1137 = vmatpush3.bf16.msra.mxu0 %v1406_v23  ;;  %v223_v25 = vand.u32 4294901760, %v1504_v5  ;;  %v1082_v45 = vpack.c.bf16 %v190_v15, %v183_v9  ;;  %v210_v46 = vsub.f32 %v1484_v57, %v209_v16  ;;  %v217_v27 = vsub.f32 %v1486_v58, %v216_v17 }
  0x49   :  { %1066 = vmatprep.subr.bf16.mxu1 %v1315_v0  ;;  %1138 = vmatprep.subr.bf16.mxu0 %v1315_v0  ;;  %v230_v33 = vand.u32 4294901760, %v1507_v6  ;;  %v1536_v28 = vsub.f32 %v1431_v35, %v110_v39  ;;  %v1541_v34 = vsub.f32 %v1435_v36, %v113_v42  ;;  %v1157_v52 = vpack.c.bf16 %v202_v62, %v195_v61 }
  0x4a   :  { %v224_v54 = vsub.f32 %v1504_v5, %v223_v25  ;;  %v237_v55 = vand.u32 4294901760, %v1520_v19  ;;  %v211_v35 = vand.u32 4294901760, %v210_v46  ;;  %v218_v39 = vand.u32 4294901760, %v217_v27 }
  0x4b   :  { %v231_v56 = vsub.f32 %v1507_v6, %v230_v33  ;;  %v244_v36 = vand.u32 4294901760, %v1525_v20  ;;  %v1556_v42 = vsub.f32 %v1455_v43, %v116_v49  ;;  %v1561_v59 = vsub.f32 %v1457_v44, %v119_v50 }
  0x4c   :  { %1068 = vmatpush3.bf16.msra.mxu1 %v1427_v32  ;;  %1140 = vmatpush3.bf16.msra.mxu0 %v1427_v32  ;;  %v1160_v60 = vpack.c.bf16 %v216_v17, %v209_v16  ;;  %v225_v61 = vand.u32 4294901760, %v224_v54  ;;  %v238_v62 = vsub.f32 %v1520_v19, %v237_v55  ;;  %v251_v2 = vand.u32 4294901760, %v1536_v28 }
  0x4d   :  { %1069 = vmatprep.subr.bf16.mxu1 %v1315_v0  ;;  %1141 = vmatprep.subr.bf16.mxu0 %v1315_v0  ;;  %v1088_v3 = vpack.c.bf16 %v218_v39, %v211_v35  ;;  %v232_v4 = vand.u32 4294901760, %v231_v56  ;;  %v258_v43 = vand.u32 4294901760, %v1541_v34  ;;  %v1163_v44 = vpack.c.bf16 %v230_v33, %v223_v25 }
  0x4e   :  { %v239_v49 = vand.u32 4294901760, %v238_v62  ;;  %v252_v50 = vsub.f32 %v1536_v28, %v251_v2  ;;  %v1166_v15 = vpack.c.bf16 %v244_v36, %v237_v55  ;;  %v1106_v54 = vpack.c.bf16 %v1439_v38, %v1437_v37 }
  0x4f   :  { %v1091_v9 = vpack.c.bf16 %v232_v4, %v225_v61  ;;  %v259_v11 = vsub.f32 %v1541_v34, %v258_v43 }
  0x50   :  { %1071 = vmatpush3.bf16.msra.mxu1 %v1452_v41  ;;  %1143 = vmatpush3.bf16.msra.mxu0 %v1452_v41  ;;  %v253_v16 = vand.u32 4294901760, %v252_v50 }
  0x51   :  { %1072 = vmatprep.subr.bf16.mxu1 %v1315_v0  ;;  %1144 = vmatprep.subr.bf16.mxu0 %v1315_v0 }
  0x54   :  { %1074 = vmatpush3.bf16.msra.mxu1 %v1477_v53  ;;  %1146 = vmatpush3.bf16.msra.mxu0 %v1477_v53 }
  0x55   :  { %1075 = vmatprep.subr.bf16.mxu1 %v1315_v0  ;;  %1147 = vmatprep.subr.bf16.mxu0 %v1315_v0 }
  0x58   :  { %1077 = vmatpush3.bf16.msra.mxu1 %v1498_v63  ;;  %1149 = vmatpush3.bf16.msra.mxu0 %v1498_v63 }
  0x59   :  { %1078 = vmatprep.subr.bf16.mxu1 %v1315_v0  ;;  %1150 = vmatprep.subr.bf16.mxu0 %v1315_v0 }
  0x5b   :  { %877 = vmatmul.mubr.f32.vlgmr.msra.gmra.mrb[0].mxu1 %v158_v8  ;;  %982 = vmatmul.mubr.f32.vlgmr.msra.gmra.mrb[0].mxu0 %v156_v51  ;;  %v1085_v51 = vpack.c.bf16 %v204_v24, %v197_v22  ;;  %v265_v8 = vand.u32 4294901760, %v1556_v42 }
  0x5c   :  { %1080 = vmatpush3.bf16.msra.mxu1 %v1079_v14  ;;  %1152 = vmatpush3.bf16.msra.mxu0 %v1151_v7  ;;  %v245_v7 = vsub.f32 %v1525_v20, %v244_v36  ;;  %v272_v14 = vand.u32 4294901760, %v1561_v59 }
  0x5d   :  { %1081 = vmatprep.subr.bf16.mxu1 %v1315_v0  ;;  %1153 = vmatprep.subr.bf16.mxu0 %v1315_v0  ;;  %v266_v22 = vsub.f32 %v1556_v42, %v265_v8 }
  0x5e   :  { %911 = vmatprep.mubr.msk.f32.mxu1 %vm1316_vm0, %v1317_v1  ;;  %1016 = vmatprep.mubr.msk.f32.mxu0 %vm1316_vm0, %v1317_v1  ;;  %v246_v10 = vand.u32 4294901760, %v245_v7  ;;  %v273_v24 = vsub.f32 %v1561_v59, %v272_v14 }
  0x5f   :  { %v267_v46 = vand.u32 4294901760, %v266_v22 }
  0x60   :  { %1083 = vmatpush3.bf16.msra.mxu1 %v1082_v45  ;;  %1155 = vmatpush3.bf16.msra.mxu0 %v1154_v21  ;;  %v1094_v17 = vpack.c.bf16 %v246_v10, %v239_v49  ;;  %v260_v21 = vand.u32 4294901760, %v259_v11  ;;  %v1169_v45 = vpack.c.bf16 %v258_v43, %v251_v2  ;;  %v274_v27 = vand.u32 4294901760, %v273_v24 }
  0x61   :  { %1084 = vmatprep.subr.bf16.mxu1 %v1315_v0  ;;  %1156 = vmatprep.subr.bf16.mxu0 %v1315_v0 }
  0x62   :  { %v1097_v25 = vpack.c.bf16 %v260_v21, %v253_v16  ;;  %v1100_v33 = vpack.c.bf16 %v274_v27, %v267_v46 }
  0x64   :  { %1086 = vmatpush3.bf16.msra.mxu1 %v1085_v51  ;;  %1158 = vmatpush3.bf16.msra.mxu0 %v1157_v52  ;;  %v1172_v51 = vpack.c.bf16 %v272_v14, %v265_v8  ;;  %v1103_v52 = vpack.c.bf16 %v1423_v31, %v1418_v29  ;;  %v1109_v29 = vpack.c.bf16 %v1465_v48, %v1463_v47  ;;  %v741_v48 = vld [vmem:[%s1650_s3] ss:$0 sm:$0xff] }
  0x65   :  { %1087 = vmatprep.subr.bf16.mxu1 %v1315_v0  ;;  %1159 = vmatprep.subr.bf16.mxu0 %v1315_v0 }
  0x68   :  { %1089 = vmatpush3.bf16.msra.mxu1 %v1088_v3  ;;  %1161 = vmatpush3.bf16.msra.mxu0 %v1160_v60 }
  0x69   :  { %1090 = vmatprep.subr.bf16.mxu1 %v1315_v0  ;;  %1162 = vmatprep.subr.bf16.mxu0 %v1315_v0 }
  0x6c   :  { %1092 = vmatpush3.bf16.msra.mxu1 %v1091_v9  ;;  %1164 = vmatpush3.bf16.msra.mxu0 %v1163_v44 }
  0x6d   :  { %1093 = vmatprep.subr.bf16.mxu1 %v1315_v0  ;;  %1165 = vmatprep.subr.bf16.mxu0 %v1315_v0 }
  0x70   :  { %1095 = vmatpush3.bf16.msra.mxu1 %v1094_v17  ;;  %1167 = vmatpush3.bf16.msra.mxu0 %v1166_v15 }
  0x71   :  { %1096 = vmatprep.subr.bf16.mxu1 %v1315_v0  ;;  %1168 = vmatprep.subr.bf16.mxu0 %v1315_v0 }
  0x74   :  { %1098 = vmatpush3.bf16.msra.mxu1 %v1097_v25  ;;  %1170 = vmatpush3.bf16.msra.mxu0 %v1169_v45 }
  0x75   :  { %1099 = vmatprep.subr.bf16.mxu1 %v1315_v0  ;;  %1171 = vmatprep.subr.bf16.mxu0 %v1315_v0 }
  0x78   :  { %1101 = vmatpush3.bf16.msra.mxu1 %v1100_v33  ;;  %1173 = vmatpush3.bf16.msra.mxu0 %v1172_v51 }
  0x79   :  { %1102 = vmatprep.subr.bf16.mxu1 %v1315_v0  ;;  %1174 = vmatprep.subr.bf16.mxu0 %v1315_v0 }
  0x7b   :  { %912 = vmatmul.mubr.f32.vlgmr.msra.gmra.mrb[0].mxu1 %v1421_v30  ;;  %1017 = vmatmul.mubr.f32.vlgmr.msra.gmra.mrb[0].mxu0 %v1421_v30 }
  0x7c   :  { %1104 = vmatpush3.bf16.msra.mxu1 %v1103_v52  ;;  %1176 = vmatpush3.bf16.msra.mxu0 %v1386_v12  ;;  %v1112_v12 = vpack.c.bf16 %v1486_v58, %v1484_v57 }
  0x7d   :  { %1105 = vmatprep.subr.bf16.mxu1 %v1315_v0  ;;  %1177 = vmatprep.subr.bf16.mxu0 %v1315_v0 }
  0x7e   :  { %946 = vmatprep.mubr.msk.f32.mxu1 %vm1316_vm0, %v1317_v1  ;;  %1051 = vmatprep.mubr.msk.f32.mxu0 %vm1316_vm0, %v1317_v1  ;;  %v1115_v1 = vpack.c.bf16 %v1507_v6, %v1504_v5 }
  0x80   :  { %1107 = vmatpush3.bf16.msra.mxu1 %v1106_v54  ;;  %1179 = vmatpush3.bf16.msra.mxu0 %v1390_v13  ;;  %v1118_v13 = vpack.c.bf16 %v1525_v20, %v1520_v19 }
  0x81   :  { %1108 = vmatprep.subr.bf16.mxu1 %v1315_v0  ;;  %1180 = vmatprep.subr.bf16.mxu0 %v1315_v0 }
  0x84   :  { %1110 = vmatpush3.bf16.msra.mxu1 %v1109_v29  ;;  %1182 = vmatpush3.bf16.msra.mxu0 %v1396_v18  ;;  %v1121_v18 = vpack.c.bf16 %v1541_v34, %v1536_v28 }
  0x85   :  { %1111 = vmatprep.subr.bf16.mxu1 %v1315_v0  ;;  %1183 = vmatprep.subr.bf16.mxu0 %v1315_v0 }
  0x88   :  { %1113 = vmatpush3.bf16.msra.mxu1 %v1112_v12  ;;  %1185 = vmatpush3.bf16.msra.mxu0 %v1406_v23  ;;  %v1124_v23 = vpack.c.bf16 %v1561_v59, %v1556_v42 }
  0x89   :  { %1114 = vmatprep.subr.bf16.mxu1 %v1315_v0  ;;  %1186 = vmatprep.subr.bf16.mxu0 %v1315_v0 }
  0x8c   :  { %1116 = vmatpush3.bf16.msra.mxu1 %v1115_v1  ;;  %1188 = vmatpush3.bf16.msra.mxu0 %v1427_v32  ;;  %v56_v32 = vld [vmem:[#allocation2] sm:$0xf] }
  0x8d   :  { %1117 = vmatprep.subr.bf16.mxu1 %v1315_v0  ;;  %1189 = vmatprep.subr.bf16.mxu0 %v1315_v0 }
  0x90   :  { %1119 = vmatpush3.bf16.msra.mxu1 %v1118_v13  ;;  %1191 = vmatpush3.bf16.msra.mxu0 %v1452_v41 }
  0x91   :  { %1120 = vmatprep.subr.bf16.mxu1 %v1315_v0  ;;  %1192 = vmatprep.subr.bf16.mxu0 %v1315_v0 }
  0x94   :  { %1122 = vmatpush3.bf16.msra.mxu1 %v1121_v18  ;;  %1194 = vmatpush3.bf16.msra.mxu0 %v1477_v53 }
  0x95   :  { %1123 = vmatprep.subr.bf16.mxu1 %v1315_v0  ;;  %1195 = vmatprep.subr.bf16.mxu0 %v1315_v0 }
  0x98   :  { %1125 = vmatpush3.bf16.msra.mxu1 %v1124_v23  ;;  %1197 = vmatpush3.bf16.msra.mxu0 %v1498_v63 }
  0x9b   :  { %947 = vmatmul.mubr.f32.vlgmr.msra.gmra.mrb[0].mxu1 %v1444_v40  ;;  %1052 = vmatmul.mubr.f32.vlgmr.msra.gmra.mrb[0].mxu0 %v1421_v30 }
 0x16e   :  { %v415_v31 = vpop.f32.mrb[0].mxu1  ;;  %v710_v37 = vpop.f32.mrb[0].mxu0 }
 0x16f   :  { %v1198_v38 = vadd.f32 %v710_v37, %v415_v31  ;;  %v948_v41 = vpop.f32.mrb[1].mxu1  ;;  %v1053_v47 = vpop.f32.mrb[1].mxu0 }
 0x171   :  { %v714_v53 = vmul.f32 %v1198_v38, %v56_v32 }
 0x173   :  { %v722_v0 = vadd.f32 %v741_v48, %v714_v53 }
 0x175   :  { %v723_v57 = vadd.f32 %v722_v0, %v1410_v26 }
 0x177   :  { %724 = vst [vmem:[#allocation8] sm:$0xf] %v723_v57 }
 0x178   :  { %1293 = shalt.err (!%p1290_p0)
}
 0x179   :  { %s1294_s5 = scalar_lea.hbm %s1651_s4, 64 }
 0x17a   :  { %p1295_p1 = scmp.ne.s32.totalorder %s1651_s4, %s1294_s5  ;;  %p1298_p2 = scmp.lt.u32.totalorder %s1294_s5, %s1651_s4 }
 0x17c   :  { %p1300_p3 = pnand %p1298_p2, %p1295_p1 }
 0x17e   :  { %1303 = shalt.err (!%p1300_p3)
}
 0x17f   :  { %734 = dma.vmem_to_hbm [thread:$0]  %s732_s27, 64, %s1651_s4, [#allocation4]  }
 0x180   :  { %1308 = dma.done.wait [#allocation4], 64  }
 0x181   :  { %1309 = vsyncadd [#allocation4], 4294967232 }
 0x182   :  { %738 = vsyncpa [#allocation3], 1 }
 0x183   :  { %739 = vsyncpa [#allocation6], 1 }
 0x184   :  { %740 = vsyncpa [#allocation4], 1 }

</bundles_post_ra>
